<compile_context>
chip_gen: v7x
topology: tpu7x:2x2x1
jax: 0.10.0
libtpu: 0.0.40
codegen_flags: <defaults>
</compile_context>

<pallas_src>
import numpy as np
import jax
import jax.numpy as jnp
from jax.experimental import pallas as pl
from jax.experimental.pallas import tpu as pltpu


# ----------------------------- Pallas kernel ------------------------------ #

def mlp4_kernel(x_ref, w1_ref, b1_ref, w2_ref, b2_ref, w3_ref, b3_ref, o_ref):
    # All matmul operands are bf16 (MXU fast path); accumulate in f32.
    # Bias-add / ReLU epilogues stay in f32 (v5e's VPU has no bf16 path).
    h = jnp.dot(x_ref[...], w1_ref[...], preferred_element_type=jnp.float32)
    h = jnp.maximum(h + b1_ref[...], 0.0)
    h = jnp.dot(h.astype(jnp.bfloat16), w2_ref[...],
                preferred_element_type=jnp.float32)
    h = jnp.maximum(h + b2_ref[...], 0.0)
    h = jnp.dot(h.astype(jnp.bfloat16), w3_ref[...],
                preferred_element_type=jnp.float32)
    o_ref[...] = jnp.maximum(h + b3_ref[...], 0.0)


# ------------------------------- wrapper ---------------------------------- #

def _round_up(x, m):
    return ((x + m - 1) // m) * m


def fold_params(params, eps=1e-5):
    """Fold eval-mode BatchNorm1d into each conv1d(k=1) weight/bias and cast
    the weights to bf16.  Run ONCE (inference-static), outside the call path."""
    def fold(w, b, g, be, m, v):
        s = g / jnp.sqrt(v + eps)
        w_f = (w * s[:, None]).T                      # (Cin, Cout)
        b_f = ((b - m) * s + be).reshape(1, -1)       # (1, Cout)
        return w_f.astype(jnp.bfloat16), b_f.astype(jnp.float32)

    w1, b1 = fold(params["w1"], params["b1"], params["g1"],
                  params["be1"], params["m1"], params["v1"])
    w2, b2 = fold(params["w2"], params["b2"], params["g2"],
                  params["be2"], params["m2"], params["v2"])
    w3, b3 = fold(params["w3"], params["b3"], params["g3"],
                  params["be3"], params["m3"], params["v3"])
    return {"w1": w1, "b1": b1, "w2": w2, "b2": b2, "w3": w3, "b3": b3}


def mlp4_forward(x, folded, *, tile_m=1024):
    """
    x       : (N, P, 2F)  — same layout the PyTorch module receives
    folded  : output of fold_params (BN-folded bf16 weights, f32 biases)
    returns : (N, P, F)   float32
    """
    N, P, c_in = x.shape
    M = N * P

    w1, b1 = folded["w1"], folded["b1"]
    w2, b2 = folded["w2"], folded["b2"]
    w3, b3 = folded["w3"], folded["b3"]
    hdim = w1.shape[1]
    c_out = w3.shape[1]

    # Row tile: large enough to amortize per-grid-step overhead, but capped so
    # the grid has >=2 steps whenever possible (v7x: 2 TensorCores/chip).
    tm = max(8, min(tile_m, _round_up(max(M // 2, 1), 8)))
    m_p = _round_up(M, tm)

    xf = x.reshape(M, c_in).astype(jnp.bfloat16)
    if m_p != M:
        xf = jnp.pad(xf, ((0, m_p - M), (0, 0)))

    grid = (m_p // tm,)
    resident = lambda i: (0, 0)   # weights/biases: same block every grid step

    out = pl.pallas_call(
        mlp4_kernel,
        out_shape=jax.ShapeDtypeStruct((m_p, c_out), jnp.float32),
        grid=grid,
        in_specs=[
            pl.BlockSpec((tm, c_in), lambda i: (i, 0)),   # x row tile (bf16)
            pl.BlockSpec((c_in, hdim), resident),         # W1' (bf16, resident)
            pl.BlockSpec((1, hdim), resident),            # b1' (f32)
            pl.BlockSpec((hdim, hdim), resident),         # W2' (bf16, resident)
            pl.BlockSpec((1, hdim), resident),            # b2' (f32)
            pl.BlockSpec((hdim, c_out), resident),        # W3' (bf16, resident)
            pl.BlockSpec((1, c_out), resident),           # b3' (f32)
        ],
        # Unpadded output block: block last dim == full array dim (legal), so
        # no 8x padded HBM writeback and no wrapper slice copy of padding.
        out_specs=pl.BlockSpec((tm, c_out), lambda i: (i, 0)),
        compiler_params=pltpu.CompilerParams(
            dimension_semantics=("parallel",),
        ),
    )(xf, w1, b1, w2, b2, w3, b3)

    return out[:M].reshape(N, P, c_out)


mlp4_forward_jit = jax.jit(mlp4_forward, static_argnames=("tile_m",))


# --------------------------- param construction ---------------------------- #

def init_params(key, feat_len):
    """Deterministic params matching MLP4's shapes (conv k=1 weights squeezed)."""
    c_in, h, c_out = 2 * feat_len, 512, feat_len
    ks = jax.random.split(key, 9)

    def u(k, shape, fan_in):
        b = 1.0 / np.sqrt(fan_in)
        return jax.random.uniform(k, shape, jnp.float32, -b, b)

    def bn_vec(kk, n):
        k1, k2, k3, k4 = jax.random.split(kk, 4)
        return (jax.random.uniform(k1, (n,), jnp.float32, 0.5, 1.5),   # gamma
                0.1 * jax.random.normal(k2, (n,), jnp.float32),        # beta
                0.1 * jax.random.normal(k3, (n,), jnp.float32),        # running_mean
                jax.random.uniform(k4, (n,), jnp.float32, 0.5, 1.5))   # running_var

    g1, be1, m1, v1 = bn_vec(ks[2], h)
    g2, be2, m2, v2 = bn_vec(ks[5], h)
    g3, be3, m3, v3 = bn_vec(ks[8], c_out)

    return {
        "w1": u(ks[0], (h, c_in), c_in), "b1": u(ks[1], (h,), c_in),
        "g1": g1, "be1": be1, "m1": m1, "v1": v1,
        "w2": u(ks[3], (h, h), h), "b2": u(ks[4], (h,), h),
        "g2": g2, "be2": be2, "m2": m2, "v2": v2,
        "w3": u(ks[6], (c_out, h), h), "b3": u(ks[7], (c_out,), h),
        "g3": g3, "be3": be3, "m3": m3, "v3": v3,
    }


# ------------------------------ reference ---------------------------------- #

def reference_forward(x, params, eps=1e-5):
    """Numpy f32 reference: permute -> conv1d(k=1)+BN(eval)+ReLU x3 -> permute."""
    x = np.asarray(x, np.float32)
    p = {k: np.asarray(v, np.float32) for k, v in params.items()}

    def layer(h, w, b, g, be, m, v):
        # conv1d(k=1) on the permuted (N, C, P) layout == per-position linear
        y = h @ w.T + b
        y = (y - m) / np.sqrt(v + eps) * g + be
        return np.maximum(y, 0.0)

    h = layer(x, p["w1"], p["b1"], p["g1"], p["be1"], p["m1"], p["v1"])
    h = layer(h, p["w2"], p["b2"], p["g2"], p["be2"], p["m2"], p["v2"])
    h = layer(h, p["w3"], p["b3"], p["g3"], p["be3"], p["m3"], p["v3"])
    return h


# --------------------------------- main ------------------------------------ #

if __name__ == "__main__":
    feat_len = 16
    B, P = 2, 4
    N = B * P                      # module expects (B x P) x P x 2F

    key = jax.random.PRNGKey(0)
    k_in, k_par = jax.random.split(key)

    x = jax.random.normal(k_in, (N, P, 2 * feat_len), jnp.float32)
    params = init_params(k_par, feat_len)

    folded = fold_params(params)                 # one-time, outside call path
    folded = jax.tree_util.tree_map(jax.block_until_ready, folded)

    out = mlp4_forward_jit(x, folded)
    out = jax.block_until_ready(out)

    ref = reference_forward(x, params)
    # bf16 matmul operands with f32 accumulation: allow a slightly wider
    # tolerance than the f32-only version.
    np.testing.assert_allclose(np.asarray(out), ref, rtol=1e-2, atol=1e-2)

    assert out.shape == (N, P, feat_len)
    print("KERNEL_OK")
</pallas_src>

<mosaic_0001>
module attributes {stable_mosaic.version = 11 : i64} {
  func.func @mlp4_kernel(%arg0: i32, %arg1: memref<16x32xbf16, #tpu.memory_space<vmem>>, %arg2: memref<32x512xbf16, #tpu.memory_space<vmem>>, %arg3: memref<1x512xf32, #tpu.memory_space<vmem>>, %arg4: memref<512x512xbf16, #tpu.memory_space<vmem>>, %arg5: memref<1x512xf32, #tpu.memory_space<vmem>>, %arg6: memref<512x16xbf16, #tpu.memory_space<vmem>>, %arg7: memref<1x16xf32, #tpu.memory_space<vmem>>, %arg8: memref<16x16xf32, #tpu.memory_space<vmem>>) attributes {dimension_semantics = [#tpu.dimension_semantics<parallel>], iteration_bounds = array<i64: 2>, scalar_prefetch = 0 : i64, scratch_operands = 0 : i64, tpu.core_type = #tpu.core_type<tc>, window_params = [{transform_indices = @transform_0, window_bounds = array<i64: 16, 32>}, {pipeline_mode = #tpu.pipeline_mode<synchronous>, transform_indices = @transform_1, window_bounds = array<i64: 32, 512>}, {pipeline_mode = #tpu.pipeline_mode<synchronous>, transform_indices = @transform_2, window_bounds = array<i64: 1, 512>}, {pipeline_mode = #tpu.pipeline_mode<synchronous>, transform_indices = @transform_3, window_bounds = array<i64: 512, 512>}, {pipeline_mode = #tpu.pipeline_mode<synchronous>, transform_indices = @transform_4, window_bounds = array<i64: 1, 512>}, {pipeline_mode = #tpu.pipeline_mode<synchronous>, transform_indices = @transform_5, window_bounds = array<i64: 512, 16>}, {pipeline_mode = #tpu.pipeline_mode<synchronous>, transform_indices = @transform_6, window_bounds = array<i64: 1, 16>}, {transform_indices = @transform_7, window_bounds = array<i64: 16, 16>}]} {
    %c0 = arith.constant 0 : index
    %c0_0 = arith.constant 0 : index
    %0 = vector.load %arg1[%c0, %c0_0] : memref<16x32xbf16, #tpu.memory_space<vmem>>, vector<16x32xbf16>
    %c0_1 = arith.constant 0 : index
    %c0_2 = arith.constant 0 : index
    %1 = vector.load %arg2[%c0_1, %c0_2] : memref<32x512xbf16, #tpu.memory_space<vmem>>, vector<32x512xbf16>
    %cst = arith.constant dense<0.000000e+00> : vector<16x512xf32>
    %2 = tpu.matmul %0, %1, %cst {dimension_numbers = #tpu.dot_dimension_numbers<[1], [0], [0], [1], [0, 0, 1, 1], [], []>} : vector<16x32xbf16>, vector<32x512xbf16>, vector<16x512xf32> -> vector<16x512xf32>
    %c0_3 = arith.constant 0 : index
    %c0_4 = arith.constant 0 : index
    %3 = vector.load %arg3[%c0_3, %c0_4] : memref<1x512xf32, #tpu.memory_space<vmem>>, vector<1x512xf32>
    %4 = vector.broadcast %3 : vector<1x512xf32> to vector<16x512xf32>
    %5 = arith.addf %2, %4 : vector<16x512xf32>
    %cst_5 = arith.constant 0.000000e+00 : f32
    %6 = vector.broadcast %cst_5 : f32 to vector<16x512xf32>
    %7 = arith.maximumf %5, %6 : vector<16x512xf32>
    %8 = arith.truncf %7 : vector<16x512xf32> to vector<16x512xbf16>
    %c0_6 = arith.constant 0 : index
    %c0_7 = arith.constant 0 : index
    %9 = vector.load %arg4[%c0_6, %c0_7] : memref<512x512xbf16, #tpu.memory_space<vmem>>, vector<512x512xbf16>
    %cst_8 = arith.constant dense<0.000000e+00> : vector<16x512xf32>
    %10 = tpu.matmul %8, %9, %cst_8 {dimension_numbers = #tpu.dot_dimension_numbers<[1], [0], [0], [1], [0, 0, 1, 1], [], []>} : vector<16x512xbf16>, vector<512x512xbf16>, vector<16x512xf32> -> vector<16x512xf32>
    %c0_9 = arith.constant 0 : index
    %c0_10 = arith.constant 0 : index
    %11 = vector.load %arg5[%c0_9, %c0_10] : memref<1x512xf32, #tpu.memory_space<vmem>>, vector<1x512xf32>
    %12 = vector.broadcast %11 : vector<1x512xf32> to vector<16x512xf32>
    %13 = arith.addf %10, %12 : vector<16x512xf32>
    %cst_11 = arith.constant 0.000000e+00 : f32
    %14 = vector.broadcast %cst_11 : f32 to vector<16x512xf32>
    %15 = arith.maximumf %13, %14 : vector<16x512xf32>
    %16 = arith.truncf %15 : vector<16x512xf32> to vector<16x512xbf16>
    %c0_12 = arith.constant 0 : index
    %c0_13 = arith.constant 0 : index
    %17 = vector.load %arg6[%c0_12, %c0_13] : memref<512x16xbf16, #tpu.memory_space<vmem>>, vector<512x16xbf16>
    %cst_14 = arith.constant dense<0.000000e+00> : vector<16x16xf32>
    %18 = tpu.matmul %16, %17, %cst_14 {dimension_numbers = #tpu.dot_dimension_numbers<[1], [0], [0], [1], [0, 0, 1, 1], [], []>} : vector<16x512xbf16>, vector<512x16xbf16>, vector<16x16xf32> -> vector<16x16xf32>
    %c0_15 = arith.constant 0 : index
    %c0_16 = arith.constant 0 : index
    %19 = vector.load %arg7[%c0_15, %c0_16] : memref<1x16xf32, #tpu.memory_space<vmem>>, vector<1x16xf32>
    %20 = vector.broadcast %19 : vector<1x16xf32> to vector<16x16xf32>
    %21 = arith.addf %18, %20 : vector<16x16xf32>
    %cst_17 = arith.constant 0.000000e+00 : f32
    %22 = vector.broadcast %cst_17 : f32 to vector<16x16xf32>
    %23 = arith.maximumf %21, %22 : vector<16x16xf32>
    %c0_18 = arith.constant 0 : index
    %c0_19 = arith.constant 0 : index
    %24 = vector.load %arg8[%c0_18, %c0_19] : memref<16x16xf32, #tpu.memory_space<vmem>>, vector<16x16xf32>
    tpu.vector_store %arg8[%c0_18, %c0_19], %23 {strides = array<i32>} : memref<16x16xf32, #tpu.memory_space<vmem>>, vector<16x16xf32>,
    return
  }
  func.func @transform_0(%arg0: i32) -> (i32, i32) {
    %c0_i32 = arith.constant 0 : i32
    %c0_i32_0 = arith.constant 0 : i32
    return %arg0, %c0_i32 : i32, i32
  }
  func.func @transform_1(%arg0: i32) -> (i32, i32) {
    %c0_i32 = arith.constant 0 : i32
    %c0_i32_0 = arith.constant 0 : i32
    %c0_i32_1 = arith.constant 0 : i32
    return %c0_i32, %c0_i32_0 : i32, i32
  }
  func.func @transform_2(%arg0: i32) -> (i32, i32) {
    %c0_i32 = arith.constant 0 : i32
    %c0_i32_0 = arith.constant 0 : i32
    %c0_i32_1 = arith.constant 0 : i32
    return %c0_i32, %c0_i32_0 : i32, i32
  }
  func.func @transform_3(%arg0: i32) -> (i32, i32) {
    %c0_i32 = arith.constant 0 : i32
    %c0_i32_0 = arith.constant 0 : i32
    %c0_i32_1 = arith.constant 0 : i32
    return %c0_i32, %c0_i32_0 : i32, i32
  }
  func.func @transform_4(%arg0: i32) -> (i32, i32) {
    %c0_i32 = arith.constant 0 : i32
    %c0_i32_0 = arith.constant 0 : i32
    %c0_i32_1 = arith.constant 0 : i32
    return %c0_i32, %c0_i32_0 : i32, i32
  }
  func.func @transform_5(%arg0: i32) -> (i32, i32) {
    %c0_i32 = arith.constant 0 : i32
    %c0_i32_0 = arith.constant 0 : i32
    %c0_i32_1 = arith.constant 0 : i32
    return %c0_i32, %c0_i32_0 : i32, i32
  }
  func.func @transform_6(%arg0: i32) -> (i32, i32) {
    %c0_i32 = arith.constant 0 : i32
    %c0_i32_0 = arith.constant 0 : i32
    %c0_i32_1 = arith.constant 0 : i32
    return %c0_i32, %c0_i32_0 : i32, i32
  }
  func.func @transform_7(%arg0: i32) -> (i32, i32) {
    %c0_i32 = arith.constant 0 : i32
    %c0_i32_0 = arith.constant 0 : i32
    return %arg0, %c0_i32 : i32, i32
  }
}

</mosaic_0001>

<bundles_post_ra>
// kernel: mlp4_forward.1
= control target key start
LH: loop header
LB: loop body
LE: loop exit
PB: predicated region body
PF: predicated region fallthrough
CT: control target
= control target key end

     0   :  { %12 = vsyncpa [#allocation3], 0  ;;  %s2863_s0 = inlined_call_operand.vmem [shape: bf16[32,32], index: 0, kind: input, shape index: {}]   ;;  %s2864_s1 = inlined_call_operand.vmem [shape: bf16[32,512], index: 1, kind: input, shape index: {}]   ;;  %s2865_s2 = inlined_call_operand.vmem [shape: f32[1,512], index: 2, kind: input, shape index: {}]   ;;  %s2866_s3 = inlined_call_operand.hbm [shape: bf16[512,512], index: 3, kind: input, shape index: {}]   ;;  %s2867_s4 = inlined_call_operand.vmem [shape: f32[1,512], index: 4, kind: input, shape index: {}]   ;;  %s2868_s5 = inlined_call_operand.vmem [shape: bf16[512,16], index: 5, kind: input, shape index: {}]   ;;  %s2869_s6 = inlined_call_operand.vmem [shape: f32[1,16], index: 6, kind: input, shape index: {}]   ;;  %s2870_s7 = inlined_call_operand.hbm [shape: f32[32,16], index: 7, kind: output, shape index: {}]  }
   0x1   :  { %13 = vsyncpa [#allocation4], 0 }
   0x2   :  { %15 = vsyncpa [#allocation4 + $0x1], 0  ;;  %s2569_s24 = smov 0   ;;  %s2571_s25 = smov 0  }
   0x3   :  { %s2573_s26 = smov 0   ;;  %s2575_s27 = smov 0  }
   0x4 LB: > { %s2590_s28 = sadd.s32 4294967295, %s2520_s27   ;;  %s1887_s29 = sadd.s32 4294967294, %s2520_s27   ;;  %s2520_s27 = sphi %s2575_s27, %s2886_s27   ;;  %s2516_s26 = sphi %s2573_s26, %s2885_s26   ;;  %s2512_s25 = sphi %s2571_s25, %s2884_s25   ;;  %s2508_s24 = sphi %s2569_s24, %s2883_s24  }
   0x5   : > { %s2594_s30 = sadd.s32 1, %s2520_s27   ;;  %s180_s8 = sadd.s32 1, %s2516_s26 }
   0x6   : > { %s177_s9 = ssub.s32 %s2520_s27, %s2594_s30  ;;  %p190_p0 = scmp.ne.s32.totalorder %s2516_s26, %s2512_s25 }
   0x7   : > { %p178_p1 = scmp.eq.s32.totalorder %s177_s9, 0  ;;  %p191_p2 = scmp.eq.s32.totalorder %s2590_s28, 1 }
   0x8   : > { %p196_p3 = scmp.ne.s32.totalorder %s2512_s25, %s2508_s24  ;;  %p197_p4 = scmp.eq.s32.totalorder %s1887_s29, 1 }
   0x9   : > { %s2605_s10 = scalar_select %p178_p1, %s2516_s26, %s180_s8  }
   0xa   : > { %p2607_p5 = por %p191_p2, %p190_p0  ;;  %p2611_p6 = por %p197_p4, %p196_p3 }
   0xb   : > { %p1888_p7 = scmp.ge.s32.totalorder %s2520_s27, 1  ;;  %p204_p8 = scmp.lt.s32.totalorder %s2520_s27, 3 }
   0xc   : > { %s2874_s11 = scalar_select %p2607_p5, 1, 0 }
   0xd   : > { %s2875_s12 = scalar_select %p2611_p6, 1, 0 }
   0xe   : > { %p2871_p9 = scmp.eq.s32.totalorder %s2590_s28, 0  ;;  %p2618_p10 = pnand %p1888_p7, %p204_p8 }
   0xf   : > { %s2522_s14 = smov [#allocation2]   ;;  %s2426_s19 = scalar_lea.hbm %s2866_s3, 16384 }
  0x10   : > { %s2876_s13 = scalar_select %p2618_p10, 1, 0 }
  0x11   : > { %s222_s15 = sshll.u32 %s2522_s14, 4  ;;  %p2140_p11 = pneg %p2618_p10  ;;  %s223_s15 = int_to_ptr.vmem [resolvable:$true] %s222_s15 }
  0x12   : > { %p2427_p13 = scmp.ne.s32.totalorder %s2866_s3, %s2426_s19  ;;  %p2433_p3 = scmp.lt.u32.totalorder %s2426_s19, %s2866_s3 }
  0x13   : > { %p2626_p12 = pnand %p2871_p9, %p2140_p11 }
  0x15   : > { %p2428_p0 = pneg %p2626_p12 }
  0x17   : > { %p2429_p1 = pnand %p2428_p0, %p2427_p13 }
  0x19   : > { %p2430_p2 = pneg %p2429_p1 }
  0x1b   : > { %p2435_p4 = pnand %p2433_p3, %p2430_p2 }
  0x1d   : > { %2438 = shalt.err (!%p2435_p4)
}
  0x1e   : > { %s2439_s29 = scalar_lea.vmem %s223_s15, 16384  ;;  %p2447_p9 = scmp.lt.s32.totalorder %s223_s15, %s223_s15 }
  0x1f   : > { %p2440_p7 = scmp.ne.s32.totalorder %s223_s15, %s2439_s29  ;;  %p2448_p6 = scmp.lt.s32.totalorder %s2439_s29, %s2439_s29 }
  0x21   : > { %p2442_p8 = pnand %p2440_p7, %p2428_p0  ;;  %p2449_p5 = por %p2448_p6, %p2447_p9 }
  0x23   : > { %p2443_p11 = pneg %p2442_p8 }
  0x25   : > { %p2450_p10 = pnand %p2449_p5, %p2443_p11 }
  0x27   : > { %2453 = shalt.err (!%p2450_p10)
}
  0x28   : > { %s2523_s8 = smov 256   ;;  %s2524_s9 = smov 16  }
  0x29   : > { %2143 = dma.hbm_to_vmem [thread:$0]  (!%p2626_p12), %s2866_s3, 16384, %s223_s15, [#allocation3], %s2523_s8, %s2523_s8, %s2524_s9  }
  0x2a   : > { %p2878_p13 = scmp.ne.s32.totalorder %s2876_s13, 0 }
  0x2b   : > { %p2879_p1 = scmp.eq.s32.totalorder (!%p2878_p13), %s2590_s28, 0 }
  0x2c   : > { %256 = sbr.rel (%p2878_p13) target bundleno = 808 (0x328), region = 48 }
  0x33   : > { %2499 = dma.done.wait (%p2879_p1), [#allocation3], 16384   ;;  %p2880_p0 = pmov %p2879_p1 }
  0x34   : > { %s1894_s18 = sshll.u32 %s2590_s28, 1  ;;  %v2525_v0 = vmov 0   ;;  %v2189_v1 = vld [vmem:[%s2864_s1 + $0x4] ss:$16 sps:$4 sm:$0xff]   ;;  %v2191_v2 = vld [vmem:[%s2864_s1] ss:$16 sps:$4 sm:$0xff]  }
  0x35   : > { %2501 = vsyncadd (%p2880_p0), [#allocation3], 4294950912  ;;  %409 = vmatprep.mubr.bf16.mxu0 %v2525_v0  ;;  %p289_p5 = scmp.lt.s32.totalorder %s1894_s18, 3  ;;  %452 = vmatprep.mubr.bf16.mxu1 %v2525_v0  ;;  %v2192_v3 = vld [vmem:[%s2864_s1 + $0x24] ss:$16 sps:$4 sm:$0xff]   ;;  %vm373_vm0 = vcmask 261120  }
  0x36   : > { %377 = vmatprep.subr.bf16.mxu0 %v2189_v1  ;;  %v2194_v4 = vld [vmem:[%s2864_s1 + $0x20] ss:$16 sps:$4 sm:$0xff]   ;;  %v2196_v6 = vld [vmem:[%s2864_s1 + $0xc] ss:$16 sps:$4 sm:$0xff]   ;;  %v2198_v7 = vld [vmem:[%s2864_s1 + $0x8] ss:$16 sps:$4 sm:$0xff]  }
  0x37   : > { %s2888_s18 = smov (!%p289_p5, %s1894_s18), 3  ;;  %378 = vmatpush1.bf16.msra.mxu0 %v2191_v2  ;;  %v2199_v8 = vld [vmem:[%s2864_s1 + $0x2c] ss:$16 sps:$4 sm:$0xff]   ;;  %420 = vmatprep.subr.bf16.mxu1 %v2196_v6  ;;  %v2201_v9 = vld [vmem:[%s2864_s1 + $0x28] ss:$16 sps:$4 sm:$0xff]   ;;  %s285_s15 = sand.u32 1, %s2512_s25  }
  0x38   : > { %s1895_s16 = sshll.u32 %s2888_s18, 2  ;;  %379 = vmatprep.subr.bf16.mxu0 %v2192_v3  ;;  %421 = vmatpush1.bf16.msra.mxu1 %v2198_v7  ;;  %v2202_v10 = vld [vmem:[#allocation2] ss:$16 sps:$4 sm:$0xff]   ;;  %v2204_v11 = vld [vmem:[#allocation2 + $0x4] ss:$16 sps:$4 sm:$0xff]   ;;  %s1893_s21 = sshll.u32 %s285_s15, 4 }
  0x39   : > { %s292_s23 = scalar_lea.vmem %s2863_s0, %s1895_s16  ;;  %422 = vmatprep.subr.bf16.mxu1 %v2199_v8  ;;  %v2207_v12 = vld [vmem:[#allocation2 + $0xc] ss:$16 sps:$4 sm:$0xff]   ;;  %v2210_v13 = vld [vmem:[#allocation2 + $0x24] ss:$16 sps:$4 sm:$0xff]   ;;  %v2205_v14 = vld [vmem:[#allocation2 + $0x8] ss:$16 sps:$4 sm:$0xff]  }
  0x3a   : > { %v2195_v5 = vld [vmem:[%s292_s23] sm:$0xff]   ;;  %v2213_v16 = vld [vmem:[#allocation2 + $0x2c] ss:$16 sps:$4 sm:$0xff]   ;;  %v2211_v18 = vld [vmem:[#allocation2 + $0x28] ss:$16 sps:$4 sm:$0xff]   ;;  %s2073_s29 = sshll.u32 %s2590_s28, 8 }
  0x3b   : > { %380 = vmatpush1.bf16.msra.mxu0 %v2194_v4  ;;  %v2208_v15 = vld [vmem:[#allocation2 + $0x20] ss:$16 sps:$4 sm:$0xff]   ;;  %v2216_v17 = vld [vmem:[#allocation2 + $0x44] ss:$16 sps:$4 sm:$0xff]   ;;  %v2219_v20 = vld [vmem:[#allocation2 + $0x4c] ss:$16 sps:$4 sm:$0xff]   ;;  %s2818_s18 = scalar_lea.hbm %s2870_s7, %s2073_s29 }
  0x3c   : > { %1265 = vmatprep.subr.bf16.mxu0 %v2204_v11  ;;  %423 = vmatpush1.bf16.msra.mxu1 %v2201_v9  ;;  %v2214_v19 = vld [vmem:[#allocation2 + $0x40] ss:$16 sps:$4 sm:$0xff]   ;;  %v2222_v21 = vld [vmem:[#allocation2 + $0x64] ss:$16 sps:$4 sm:$0xff]   ;;  %v2217_v22 = vld [vmem:[#allocation2 + $0x48] ss:$16 sps:$4 sm:$0xff]  }
  0x3d   : > { %1351 = vmatprep.subr.bf16.mxu1 %v2207_v12  ;;  %v2220_v23 = vld [vmem:[#allocation2 + $0x60] ss:$16 sps:$4 sm:$0xff]   ;;  %v2225_v24 = vld [vmem:[#allocation2 + $0x6c] ss:$16 sps:$4 sm:$0xff]   ;;  %v2228_v25 = vld [vmem:[#allocation2 + $0x84] ss:$16 sps:$4 sm:$0xff]   ;;  %v308_v12 = vlaneseq }
  0x3e   : > { %1905 = vmatmul.mubr.msk.bf16.vlgmr.msra.gmra.mrb[0].mxu0 %vm373_vm0, %v2195_v5  ;;  %v2223_v26 = vld [vmem:[#allocation2 + $0x68] ss:$16 sps:$4 sm:$0xff]   ;;  %v2226_v27 = vld [vmem:[#allocation2 + $0x80] ss:$16 sps:$4 sm:$0xff]   ;;  %v2231_v28 = vld [vmem:[#allocation2 + $0x8c] ss:$16 sps:$4 sm:$0xff]  }
  0x3f   : > { %1266 = vmatpush1.bf16.msra.mxu0 %v2202_v10  ;;  %1906 = vmatmul.mubr.msk.bf16.vlgmr.msra.gmra.mrb[0].mxu1 %vm373_vm0, %v2195_v5  ;;  %v2234_v29 = vld [vmem:[#allocation2 + $0xa4] ss:$16 sps:$4 sm:$0xff]   ;;  %v2229_v30 = vld [vmem:[#allocation2 + $0x88] ss:$16 sps:$4 sm:$0xff]   ;;  %v2232_v31 = vld [vmem:[#allocation2 + $0xa0] ss:$16 sps:$4 sm:$0xff]  }
  0x40   : > { %1267 = vmatprep.subr.bf16.mxu0 %v2210_v13  ;;  %1352 = vmatpush1.bf16.msra.mxu1 %v2205_v14  ;;  %v2237_v32 = vld [vmem:[#allocation2 + $0xac] ss:$16 sps:$4 sm:$0xff]   ;;  %v2240_v33 = vld [vmem:[#allocation2 + $0xc4] ss:$16 sps:$4 sm:$0xff]   ;;  %v2235_v34 = vld [vmem:[#allocation2 + $0xa8] ss:$16 sps:$4 sm:$0xff]  }
  0x41   : > { %1353 = vmatprep.subr.bf16.mxu1 %v2213_v16  ;;  %v2238_v35 = vld [vmem:[#allocation2 + $0xc0] ss:$16 sps:$4 sm:$0xff]   ;;  %v2243_v36 = vld [vmem:[#allocation2 + $0xcc] ss:$16 sps:$4 sm:$0xff]   ;;  %v2246_v37 = vld [vmem:[#allocation2 + $0xe4] ss:$16 sps:$4 sm:$0xff]  }
  0x42   : > { %v2241_v38 = vld [vmem:[#allocation2 + $0xc8] ss:$16 sps:$4 sm:$0xff]   ;;  %v2244_v39 = vld [vmem:[#allocation2 + $0xe0] ss:$16 sps:$4 sm:$0xff]   ;;  %v2249_v40 = vld [vmem:[#allocation2 + $0xec] ss:$16 sps:$4 sm:$0xff]  }
  0x43   : > { %1268 = vmatpush1.bf16.msra.mxu0 %v2208_v15  ;;  %v2252_v41 = vld [vmem:[#allocation2 + $0x104] ss:$16 sps:$4 sm:$0xff]   ;;  %v2247_v42 = vld [vmem:[#allocation2 + $0xe8] ss:$16 sps:$4 sm:$0xff]   ;;  %v2250_v43 = vld [vmem:[#allocation2 + $0x100] ss:$16 sps:$4 sm:$0xff]  }
  0x44   : > { %1269 = vmatprep.subr.bf16.mxu0 %v2216_v17  ;;  %1354 = vmatpush1.bf16.msra.mxu1 %v2211_v18  ;;  %v2255_v44 = vld [vmem:[#allocation2 + $0x10c] ss:$16 sps:$4 sm:$0xff]   ;;  %v2258_v45 = vld [vmem:[#allocation2 + $0x124] ss:$16 sps:$4 sm:$0xff]   ;;  %v2253_v46 = vld [vmem:[#allocation2 + $0x108] ss:$16 sps:$4 sm:$0xff]  }
  0x45   : > { %1355 = vmatprep.subr.bf16.mxu1 %v2219_v20  ;;  %v2256_v47 = vld [vmem:[#allocation2 + $0x120] ss:$16 sps:$4 sm:$0xff]   ;;  %v2261_v48 = vld [vmem:[#allocation2 + $0x12c] ss:$16 sps:$4 sm:$0xff]   ;;  %v2264_v49 = vld [vmem:[#allocation2 + $0x144] ss:$16 sps:$4 sm:$0xff]  }
  0x46   : > { %v2259_v50 = vld [vmem:[#allocation2 + $0x128] ss:$16 sps:$4 sm:$0xff]   ;;  %v2262_v51 = vld [vmem:[#allocation2 + $0x140] ss:$16 sps:$4 sm:$0xff]   ;;  %v2267_v52 = vld [vmem:[#allocation2 + $0x14c] ss:$16 sps:$4 sm:$0xff]  }
  0x47   : > { %1270 = vmatpush1.bf16.msra.mxu0 %v2214_v19  ;;  %v2270_v53 = vld [vmem:[#allocation2 + $0x164] ss:$16 sps:$4 sm:$0xff]   ;;  %v2265_v54 = vld [vmem:[#allocation2 + $0x148] ss:$16 sps:$4 sm:$0xff]   ;;  %v2268_v55 = vld [vmem:[#allocation2 + $0x160] ss:$16 sps:$4 sm:$0xff]  }
  0x48   : > { %1271 = vmatprep.subr.bf16.mxu0 %v2222_v21  ;;  %1356 = vmatpush1.bf16.msra.mxu1 %v2217_v22  ;;  %v2273_v56 = vld [vmem:[#allocation2 + $0x16c] ss:$16 sps:$4 sm:$0xff]   ;;  %v2276_v57 = vld [vmem:[#allocation2 + $0x184] ss:$16 sps:$4 sm:$0xff]   ;;  %v2271_v58 = vld [vmem:[#allocation2 + $0x168] ss:$16 sps:$4 sm:$0xff]  }
  0x49   : > { %1357 = vmatprep.subr.bf16.mxu1 %v2225_v24  ;;  %v2274_v59 = vld [vmem:[#allocation2 + $0x180] ss:$16 sps:$4 sm:$0xff]   ;;  %v2279_v60 = vld [vmem:[#allocation2 + $0x18c] ss:$16 sps:$4 sm:$0xff]   ;;  %v2282_v61 = vld [vmem:[#allocation2 + $0x1a4] ss:$16 sps:$4 sm:$0xff]  }
  0x4a   : > { %v2277_v62 = vld [vmem:[#allocation2 + $0x188] ss:$16 sps:$4 sm:$0xff]   ;;  %v2280_v63 = vld [vmem:[#allocation2 + $0x1a0] ss:$16 sps:$4 sm:$0xff]   ;;  %v2285_v0 = vld [vmem:[#allocation2 + $0x1ac] ss:$16 sps:$4 sm:$0xff]  }
  0x4b   : > { %1272 = vmatpush1.bf16.msra.mxu0 %v2220_v23  ;;  %v2283_v1 = vld [vmem:[#allocation2 + $0x1a8] ss:$16 sps:$4 sm:$0xff]   ;;  %v2288_v2 = vld [vmem:[#allocation2 + $0x1c4] ss:$16 sps:$4 sm:$0xff]   ;;  %v2291_v3 = vld [vmem:[#allocation2 + $0x1cc] ss:$16 sps:$4 sm:$0xff]  }
  0x4c   : > { %1273 = vmatprep.subr.bf16.mxu0 %v2228_v25  ;;  %1358 = vmatpush1.bf16.msra.mxu1 %v2223_v26  ;;  %v2286_v4 = vld [vmem:[#allocation2 + $0x1c0] ss:$16 sps:$4 sm:$0xff]   ;;  %v2289_v5 = vld [vmem:[#allocation2 + $0x1c8] ss:$16 sps:$4 sm:$0xff]   ;;  %v2294_v6 = vld [vmem:[#allocation2 + $0x1e4] ss:$16 sps:$4 sm:$0xff]  }
  0x4d   : > { %1359 = vmatprep.subr.bf16.mxu1 %v2231_v28  ;;  %v2297_v7 = vld [vmem:[#allocation2 + $0x1ec] ss:$16 sps:$4 sm:$0xff]   ;;  %v2292_v8 = vld [vmem:[#allocation2 + $0x1e0] ss:$16 sps:$4 sm:$0xff]   ;;  %v2295_v9 = vld [vmem:[#allocation2 + $0x1e8] ss:$16 sps:$4 sm:$0xff]  }
  0x4e   : > { %v2300_v10 = vld [vmem:[#allocation2 + $0x204] ss:$16 sps:$4 sm:$0xff]   ;;  %v2303_v11 = vld [vmem:[#allocation2 + $0x20c] ss:$16 sps:$4 sm:$0xff]   ;;  %v2682_v13 = vshrl.u32 %v308_v12, 7  ;;  %s287_s8 = scalar_lea.vmem [#allocation5], %s1893_s21 }
  0x4f   : > { %1274 = vmatpush1.bf16.msra.mxu0 %v2226_v27  ;;  %v306_v15 = vld [vmem:[%s2865_s2] sm:$0xf]  ;;  %v2337_v12 = vld [vmem:[#allocation2 + $0x2c8] ss:$16 sps:$4 sm:$0xff]   ;;  %s1813_s9 = sshll.u32 %s287_s8, 4  ;;  %vm1796_vm1 = vcmask 130048   ;;  %s2820_s9 = int_to_ptr.vmem [resolvable:$true] %s1813_s9 }
  0x50   : > { %1275 = vmatprep.subr.bf16.mxu0 %v2234_v29  ;;  %1360 = vmatpush1.bf16.msra.mxu1 %v2229_v30  ;;  %v310_v14 = vsub.s32 0, %v2682_v13  ;;  %v314_v16 = vsub.s32 1, %v2682_v13  ;;  %v318_v18 = vsub.s32 2, %v2682_v13  ;;  %v322_v20 = vsub.s32 3, %v2682_v13  ;;  %s2822_s19 = scalar_lea.sflag [#allocation4], %s285_s15  ;;  %s2454_s28 = scalar_lea.vmem %s2820_s9, 256 }
  0x51   : > { %1361 = vmatprep.subr.bf16.mxu1 %v2237_v32  ;;  %p2455_p6 = scmp.ne.s32.totalorder %s2820_s9, %s2454_s28  ;;  %p2881_p9 = scmp.ne.s32.totalorder %s2874_s11, 0 }
  0x52   : > { %v311_v17 = vrot.slane %v306_v15, %v310_v14  ;;  %v315_v19 = vrot.slane %v306_v15, %v314_v16  ;;  %v319_v24 = vrot.slane %v306_v15, %v318_v18  ;;  %v323_v27 = vrot.slane %v306_v15, %v322_v20  ;;  %v2342_v15 = vld [vmem:[#allocation2 + $0x2e4] ss:$16 sps:$4 sm:$0xff]   ;;  %s2526_s20 = smov [#allocation5]  }
  0x53   : > { %1276 = vmatpush1.bf16.msra.mxu0 %v2232_v31  ;;  %p2456_p10 = pnand %p2455_p6, %p2881_p9  ;;  %s2458_s16 = sshll.u32 %s2526_s20, 4  ;;  %s2459_s16 = int_to_ptr.vmem [resolvable:$false] %s2458_s16 }
  0x54   : > { %1277 = vmatprep.subr.bf16.mxu0 %v2240_v33  ;;  %1362 = vmatpush1.bf16.msra.mxu1 %v2235_v34  ;;  %s2460_s13 = scalar_lea.vmem %s2459_s16, 512  ;;  %p2461_p2 = scmp.lt.s32.totalorder %s2820_s9, %s2459_s16 }
  0x55   : > { %1363 = vmatprep.subr.bf16.mxu1 %v2243_v36  ;;  %p2457_p12 = pneg %p2456_p10  ;;  %p2462_p3 = scmp.lt.s32.totalorder %s2460_s13, %s2454_s28 }
  0x57   : > { %1278 = vmatpush1.bf16.msra.mxu0 %v2238_v35  ;;  %p2463_p4 = por %p2462_p3, %p2461_p2 }
  0x58   : > { %1279 = vmatprep.subr.bf16.mxu0 %v2246_v37  ;;  %1364 = vmatpush1.bf16.msra.mxu1 %v2241_v38 }
  0x59   : > { %1365 = vmatprep.subr.bf16.mxu1 %v2249_v40  ;;  %p2464_p7 = pnand %p2463_p4, %p2457_p12 }
  0x5b   : > { %1280 = vmatpush1.bf16.msra.mxu0 %v2244_v39 }
  0x5c   : > { %1281 = vmatprep.subr.bf16.mxu0 %v2252_v41  ;;  %1366 = vmatpush1.bf16.msra.mxu1 %v2247_v42 }
  0x5d   : > { %1367 = vmatprep.subr.bf16.mxu1 %v2255_v44 }
  0x5f   : > { %1282 = vmatpush1.bf16.msra.mxu0 %v2250_v43 }
  0x60   : > { %1283 = vmatprep.subr.bf16.mxu0 %v2258_v45  ;;  %1368 = vmatpush1.bf16.msra.mxu1 %v2253_v46  ;;  %v2298_v45 = vld [vmem:[#allocation2 + $0x200] ss:$16 sps:$4 sm:$0xff]   ;;  %v2301_v46 = vld [vmem:[#allocation2 + $0x208] ss:$16 sps:$4 sm:$0xff]  }
  0x61   : > { %1369 = vmatprep.subr.bf16.mxu1 %v2261_v48 }
  0x63   : > { %1284 = vmatpush1.bf16.msra.mxu0 %v2256_v47 }
  0x64   : > { %1285 = vmatprep.subr.bf16.mxu0 %v2264_v49  ;;  %1370 = vmatpush1.bf16.msra.mxu1 %v2259_v50  ;;  %v2306_v49 = vld [vmem:[#allocation2 + $0x224] ss:$16 sps:$4 sm:$0xff]   ;;  %v2309_v50 = vld [vmem:[#allocation2 + $0x22c] ss:$16 sps:$4 sm:$0xff]  }
  0x65   : > { %1371 = vmatprep.subr.bf16.mxu1 %v2267_v52 }
  0x67   : > { %1286 = vmatpush1.bf16.msra.mxu0 %v2262_v51 }
  0x68   : > { %1287 = vmatprep.subr.bf16.mxu0 %v2270_v53  ;;  %1372 = vmatpush1.bf16.msra.mxu1 %v2265_v54  ;;  %v2304_v54 = vld [vmem:[#allocation2 + $0x220] ss:$16 sps:$4 sm:$0xff]  }
  0x69   : > { %1373 = vmatprep.subr.bf16.mxu1 %v2273_v56 }
  0x6b   : > { %1288 = vmatpush1.bf16.msra.mxu0 %v2268_v55  ;;  %v2307_v55 = vld [vmem:[#allocation2 + $0x228] ss:$16 sps:$4 sm:$0xff]  }
  0x6c   : > { %1289 = vmatprep.subr.bf16.mxu0 %v2276_v57  ;;  %1374 = vmatpush1.bf16.msra.mxu1 %v2271_v58  ;;  %v2312_v57 = vld [vmem:[#allocation2 + $0x244] ss:$16 sps:$4 sm:$0xff]   ;;  %v2315_v58 = vld [vmem:[#allocation2 + $0x24c] ss:$16 sps:$4 sm:$0xff]  }
  0x6d   : > { %1375 = vmatprep.subr.bf16.mxu1 %v2279_v60  ;;  %v2313_v60 = vld [vmem:[#allocation2 + $0x248] ss:$16 sps:$4 sm:$0xff]  }
  0x6f   : > { %1290 = vmatpush1.bf16.msra.mxu0 %v2274_v59  ;;  %v2310_v59 = vld [vmem:[#allocation2 + $0x240] ss:$16 sps:$4 sm:$0xff]  }
  0x70   : > { %1291 = vmatprep.subr.bf16.mxu0 %v2282_v61  ;;  %1376 = vmatpush1.bf16.msra.mxu1 %v2277_v62  ;;  %v2318_v61 = vld [vmem:[#allocation2 + $0x264] ss:$16 sps:$4 sm:$0xff]   ;;  %v2321_v62 = vld [vmem:[#allocation2 + $0x26c] ss:$16 sps:$4 sm:$0xff]  }
  0x71   : > { %1377 = vmatprep.subr.bf16.mxu1 %v2285_v0  ;;  %v2319_v0 = vld [vmem:[#allocation2 + $0x268] ss:$16 sps:$4 sm:$0xff]  }
  0x73   : > { %1292 = vmatpush1.bf16.msra.mxu0 %v2280_v63  ;;  %v2316_v63 = vld [vmem:[#allocation2 + $0x260] ss:$16 sps:$4 sm:$0xff]  }
  0x74   : > { %1378 = vmatpush1.bf16.msra.mxu1 %v2283_v1  ;;  %1293 = vmatprep.subr.bf16.mxu0 %v2288_v2  ;;  %v2324_v1 = vld [vmem:[#allocation2 + $0x284] ss:$16 sps:$4 sm:$0xff]   ;;  %v2327_v2 = vld [vmem:[#allocation2 + $0x28c] ss:$16 sps:$4 sm:$0xff]  }
  0x75   : > { %1379 = vmatprep.subr.bf16.mxu1 %v2291_v3  ;;  %v2322_v3 = vld [vmem:[#allocation2 + $0x280] ss:$16 sps:$4 sm:$0xff]  }
  0x77   : > { %1294 = vmatpush1.bf16.msra.mxu0 %v2286_v4  ;;  %v2325_v4 = vld [vmem:[#allocation2 + $0x288] ss:$16 sps:$4 sm:$0xff]  }
  0x78   : > { %1380 = vmatpush1.bf16.msra.mxu1 %v2289_v5  ;;  %1295 = vmatprep.subr.bf16.mxu0 %v2294_v6  ;;  %v2330_v5 = vld [vmem:[#allocation2 + $0x2a4] ss:$16 sps:$4 sm:$0xff]   ;;  %v2333_v6 = vld [vmem:[#allocation2 + $0x2ac] ss:$16 sps:$4 sm:$0xff]  }
  0x79   : > { %1381 = vmatprep.subr.bf16.mxu1 %v2297_v7  ;;  %v2328_v7 = vld [vmem:[#allocation2 + $0x2a0] ss:$16 sps:$4 sm:$0xff]  }
  0x7b   : > { %1296 = vmatpush1.bf16.msra.mxu0 %v2292_v8  ;;  %v2331_v8 = vld [vmem:[#allocation2 + $0x2a8] ss:$16 sps:$4 sm:$0xff]  }
  0x7c   : > { %1382 = vmatpush1.bf16.msra.mxu1 %v2295_v9  ;;  %1308 = vmatprep.subr.bf16.mxu0 %v2300_v10  ;;  %v2336_v9 = vld [vmem:[#allocation2 + $0x2c4] ss:$16 sps:$4 sm:$0xff]   ;;  %v2339_v10 = vld [vmem:[#allocation2 + $0x2cc] ss:$16 sps:$4 sm:$0xff]  }
  0x7d   : > { %1394 = vmatprep.subr.bf16.mxu1 %v2303_v11  ;;  %v2334_v11 = vld [vmem:[#allocation2 + $0x2c0] ss:$16 sps:$4 sm:$0xff]  }
 0x111   : > { %v411_v21 = vpop.f32.mrb[0].mxu0 }
 0x112   : > { %v412_v22 = vadd.f32 %v411_v21, %v311_v17  ;;  %v413_v23 = vpop.f32.mrb[1].mxu0  ;;  %v454_v31 = vpop.f32.mrb[0].mxu1  ;;  %v2343_v21 = vld [vmem:[#allocation2 + $0x2e8] ss:$16 sps:$4 sm:$0xff]  }
 0x113   : > { %v414_v25 = vadd.f32 %v413_v23, %v315_v19  ;;  %v415_v26 = vpop.f32.mrb[2].mxu0  ;;  %v455_v34 = vadd.f32 %v454_v31, %v319_v24  ;;  %v456_v35 = vpop.f32.mrb[1].mxu1  ;;  %v2351_v23 = vld [vmem:[#allocation2 + $0x30c] ss:$16 sps:$4 sm:$0xff]  }
 0x114   : > { %v416_v28 = vadd.f32 %v415_v26, %v311_v17  ;;  %v417_v29 = vpop.f32.mrb[3].mxu0  ;;  %v463_v32 = vmax.f32 %v412_v22, 0.0  ;;  %v457_v38 = vadd.f32 %v456_v35, %v323_v27  ;;  %v458_v39 = vpop.f32.mrb[2].mxu1  ;;  %v2345_v17 = vld [vmem:[#allocation2 + $0x2ec] ss:$16 sps:$4 sm:$0xff]  }
 0x115   : > { %v418_v30 = vadd.f32 %v417_v29, %v315_v19  ;;  %v464_v36 = vmax.f32 %v414_v25, 0.0  ;;  %v465_v41 = vmax.f32 %v455_v34, 0.0  ;;  %v459_v42 = vadd.f32 %v458_v39, %v319_v24  ;;  %v460_v43 = vpop.f32.mrb[3].mxu1  ;;  %v2340_v19 = vld [vmem:[#allocation2 + $0x2e0] ss:$16 sps:$4 sm:$0xff]  }
 0x116   : > { %v467_v33 = vmax.f32 %v416_v28, 0.0  ;;  %v466_v47 = vmax.f32 %v457_v38, 0.0  ;;  %v461_v48 = vadd.f32 %v460_v43, %v323_v27  ;;  %v2348_v22 = vld [vmem:[#allocation2 + $0x304] ss:$16 sps:$4 sm:$0xff]   ;;  %v2346_v24 = vld [vmem:[#allocation2 + $0x300] ss:$16 sps:$4 sm:$0xff]  }
 0x117   : > { %v468_v37 = vmax.f32 %v418_v30, 0.0  ;;  %v469_v51 = vmax.f32 %v459_v42, 0.0  ;;  %v2349_v25 = vld [vmem:[#allocation2 + $0x308] ss:$16 sps:$4 sm:$0xff]   ;;  %v2354_v26 = vld [vmem:[#allocation2 + $0x324] ss:$16 sps:$4 sm:$0xff]  }
 0x118   : > { %v471_v40 = vpack.c.bf16 %v467_v33, %v463_v32  ;;  %v470_v52 = vmax.f32 %v461_v48, 0.0  ;;  %v2357_v27 = vld [vmem:[#allocation2 + $0x32c] ss:$16 sps:$4 sm:$0xff]   ;;  %v2352_v28 = vld [vmem:[#allocation2 + $0x320] ss:$16 sps:$4 sm:$0xff]  }
 0x119   : > { %v472_v44 = vpack.c.bf16 %v468_v37, %v464_v36  ;;  %v2699_v53 = vpack.c.bf16 %v469_v51, %v465_v41  ;;  %v2355_v29 = vld [vmem:[#allocation2 + $0x328] ss:$16 sps:$4 sm:$0xff]   ;;  %v2360_v30 = vld [vmem:[#allocation2 + $0x344] ss:$16 sps:$4 sm:$0xff]   ;;  %v2363_v31 = vld [vmem:[#allocation2 + $0x34c] ss:$16 sps:$4 sm:$0xff]  }
 0x11a   : > { %v474_v56 = vpack.c.bf16 %v470_v52, %v466_v47  ;;  %v2358_v32 = vld [vmem:[#allocation2 + $0x340] ss:$16 sps:$4 sm:$0xff]   ;;  %v2361_v33 = vld [vmem:[#allocation2 + $0x348] ss:$16 sps:$4 sm:$0xff]   ;;  %v2366_v34 = vld [vmem:[#allocation2 + $0x364] ss:$16 sps:$4 sm:$0xff]  }
 0x11b   : > { %1297 = vmatprep.mubr.bf16.mxu0 %v472_v44  ;;  %1383 = vmatprep.mubr.bf16.mxu1 %v472_v44  ;;  %v2369_v35 = vld [vmem:[#allocation2 + $0x36c] ss:$16 sps:$4 sm:$0xff]   ;;  %v2364_v36 = vld [vmem:[#allocation2 + $0x360] ss:$16 sps:$4 sm:$0xff]   ;;  %v2367_v37 = vld [vmem:[#allocation2 + $0x368] ss:$16 sps:$4 sm:$0xff]  }
 0x11c   : > { %1298 = vmatmul.mubr.bf16.vlgmr.msra.gmra.mrb[4].mxu0 %v471_v40  ;;  %1384 = vmatmul.mubr.bf16.vlgmr.msra.gmra.mrb[4].mxu1 %v471_v40  ;;  %v2372_v38 = vld [vmem:[#allocation2 + $0x384] ss:$16 sps:$4 sm:$0xff]   ;;  %v2375_v39 = vld [vmem:[#allocation2 + $0x38c] ss:$16 sps:$4 sm:$0xff]   ;;  %v2370_v40 = vld [vmem:[#allocation2 + $0x380] ss:$16 sps:$4 sm:$0xff]  }
 0x11d   : > { %1309 = vmatpush1.bf16.msra.mxu0 %v2298_v45  ;;  %1395 = vmatpush1.bf16.msra.mxu1 %v2301_v46  ;;  %v2373_v41 = vld [vmem:[#allocation2 + $0x388] ss:$16 sps:$4 sm:$0xff]   ;;  %v2378_v42 = vld [vmem:[#allocation2 + $0x3a4] ss:$16 sps:$4 sm:$0xff]   ;;  %v2381_v43 = vld [vmem:[#allocation2 + $0x3ac] ss:$16 sps:$4 sm:$0xff]  }
 0x11e   : > { %1310 = vmatprep.subr.bf16.mxu0 %v2306_v49  ;;  %1396 = vmatprep.subr.bf16.mxu1 %v2309_v50  ;;  %v2376_v44 = vld [vmem:[#allocation2 + $0x3a0] ss:$16 sps:$4 sm:$0xff]   ;;  %v2379_v45 = vld [vmem:[#allocation2 + $0x3a8] ss:$16 sps:$4 sm:$0xff]   ;;  %v2384_v46 = vld [vmem:[#allocation2 + $0x3c4] ss:$16 sps:$4 sm:$0xff]  }
 0x11f   : > { %1340 = vmatprep.mubr.bf16.mxu0 %v474_v56  ;;  %1426 = vmatprep.mubr.bf16.mxu1 %v474_v56  ;;  %v2387_v47 = vld [vmem:[#allocation2 + $0x3cc] ss:$16 sps:$4 sm:$0xff]   ;;  %v2382_v48 = vld [vmem:[#allocation2 + $0x3c0] ss:$16 sps:$4 sm:$0xff]   ;;  %v2385_v49 = vld [vmem:[#allocation2 + $0x3c8] ss:$16 sps:$4 sm:$0xff]  }
 0x120   : > { %v2390_v50 = vld [vmem:[#allocation2 + $0x3e4] ss:$16 sps:$4 sm:$0xff]   ;;  %v2393_v51 = vld [vmem:[#allocation2 + $0x3ec] ss:$16 sps:$4 sm:$0xff]   ;;  %v2388_v52 = vld [vmem:[#allocation2 + $0x3e0] ss:$16 sps:$4 sm:$0xff]  }
 0x121   : > { %1311 = vmatpush1.bf16.msra.mxu0 %v2304_v54  ;;  %1397 = vmatpush1.bf16.msra.mxu1 %v2307_v55  ;;  %v2391_v54 = vld [vmem:[#allocation2 + $0x3e8] ss:$16 sps:$4 sm:$0xff]   ;;  %v2394_v55 = vld [vmem:[%s2868_s5 + $0x40] sm:$0xff]  }
 0x122   : > { %1312 = vmatprep.subr.bf16.mxu0 %v2312_v57  ;;  %1398 = vmatprep.subr.bf16.mxu1 %v2315_v58  ;;  %v2395_v56 = vld [vmem:[%s2868_s5 + $0xc0] sm:$0xff]  }
 0x123   : > { %v2396_v57 = vld [vmem:[%s2868_s5] sm:$0xff]  }
 0x124   : > { %v2397_v58 = vld [vmem:[%s2868_s5 + $0x80] sm:$0xff]  }
 0x125   : > { %1313 = vmatpush1.bf16.msra.mxu0 %v2310_v59  ;;  %1399 = vmatpush1.bf16.msra.mxu1 %v2313_v60  ;;  %v2398_v59 = vld [vmem:[%s2868_s5 + $0x48] sm:$0xff]  }
 0x126   : > { %1314 = vmatprep.subr.bf16.mxu0 %v2318_v61  ;;  %1400 = vmatprep.subr.bf16.mxu1 %v2321_v62  ;;  %v2399_v60 = vld [vmem:[%s2868_s5 + $0xc8] sm:$0xff]  }
 0x127   : > { %v2400_v61 = vld [vmem:[%s2868_s5 + $0x8] sm:$0xff]  }
 0x128   : > { %v2401_v62 = vld [vmem:[%s2868_s5 + $0x88] sm:$0xff]  }
 0x129   : > { %1315 = vmatpush1.bf16.msra.mxu0 %v2316_v63  ;;  %1401 = vmatpush1.bf16.msra.mxu1 %v2319_v0  ;;  %v2402_v63 = vld [vmem:[%s2868_s5 + $0x50] sm:$0xff]  }
 0x12a   : > { %1316 = vmatprep.subr.bf16.mxu0 %v2324_v1  ;;  %1402 = vmatprep.subr.bf16.mxu1 %v2327_v2  ;;  %v2404_v0 = vld [vmem:[%s2868_s5 + $0x10] sm:$0xff]   ;;  %v2406_v2 = vld [vmem:[%s2868_s5 + $0x58] sm:$0xff]  }
 0x12b   : > { %v2405_v1 = vld [vmem:[%s2868_s5 + $0x90] sm:$0xff]  }
 0x12d   : > { %1317 = vmatpush1.bf16.msra.mxu0 %v2322_v3  ;;  %1403 = vmatpush1.bf16.msra.mxu1 %v2325_v4  ;;  %v2407_v3 = vld [vmem:[%s2868_s5 + $0xd8] sm:$0xff]  }
 0x12e   : > { %1318 = vmatprep.subr.bf16.mxu0 %v2330_v5  ;;  %1404 = vmatprep.subr.bf16.mxu1 %v2333_v6  ;;  %v2408_v4 = vld [vmem:[%s2868_s5 + $0x18] sm:$0xff]   ;;  %v2410_v6 = vld [vmem:[%s2868_s5 + $0x60] sm:$0xff]  }
 0x12f   : > { %v2409_v5 = vld [vmem:[%s2868_s5 + $0x98] sm:$0xff]  }
 0x131   : > { %1319 = vmatpush1.bf16.msra.mxu0 %v2328_v7  ;;  %1405 = vmatpush1.bf16.msra.mxu1 %v2331_v8  ;;  %v2411_v7 = vld [vmem:[%s2868_s5 + $0xe0] sm:$0xff]  }
 0x132   : > { %1320 = vmatprep.subr.bf16.mxu0 %v2336_v9  ;;  %1406 = vmatprep.subr.bf16.mxu1 %v2339_v10  ;;  %v2412_v8 = vld [vmem:[%s2868_s5 + $0x20] sm:$0xff]   ;;  %v2414_v10 = vld [vmem:[%s2868_s5 + $0x68] sm:$0xff]  }
 0x133   : > { %v2413_v9 = vld [vmem:[%s2868_s5 + $0xa0] sm:$0xff]  }
 0x135   : > { %1321 = vmatpush1.bf16.msra.mxu0 %v2334_v11  ;;  %1407 = vmatpush1.bf16.msra.mxu1 %v2337_v12  ;;  %v2415_v11 = vld [vmem:[%s2868_s5 + $0xe8] sm:$0xff]  }
 0x136   : > { %1322 = vmatprep.subr.bf16.mxu0 %v2342_v15  ;;  %1408 = vmatprep.subr.bf16.mxu1 %v2345_v17  ;;  %v2416_v12 = vld [vmem:[%s2868_s5 + $0x28] sm:$0xff]   ;;  %v2418_v17 = vld [vmem:[%s2868_s5 + $0x70] sm:$0xff]  }
 0x137   : > { %v2417_v15 = vld [vmem:[%s2868_s5 + $0xa8] sm:$0xff]  }
 0x139   : > { %1323 = vmatpush1.bf16.msra.mxu0 %v2340_v19  ;;  %1409 = vmatpush1.bf16.msra.mxu1 %v2343_v21  ;;  %v2419_v19 = vld [vmem:[%s2868_s5 + $0xf0] sm:$0xff]  }
 0x13a   : > { %1324 = vmatprep.subr.bf16.mxu0 %v2348_v22  ;;  %1410 = vmatprep.subr.bf16.mxu1 %v2351_v23  ;;  %v2420_v21 = vld [vmem:[%s2868_s5 + $0x30] sm:$0xff]   ;;  %v2422_v23 = vld [vmem:[%s2868_s5 + $0x78] sm:$0xff]  }
 0x13b   : > { %v2421_v22 = vld [vmem:[%s2868_s5 + $0xb0] sm:$0xff]  }
 0x13d   : > { %1325 = vmatpush1.bf16.msra.mxu0 %v2346_v24  ;;  %1411 = vmatpush1.bf16.msra.mxu1 %v2349_v25  ;;  %v2423_v24 = vld [vmem:[%s2868_s5 + $0xf8] sm:$0xff]  }
 0x13e   : > { %1326 = vmatprep.subr.bf16.mxu0 %v2354_v26  ;;  %1412 = vmatprep.subr.bf16.mxu1 %v2357_v27  ;;  %v2424_v25 = vld [vmem:[%s2868_s5 + $0x38] sm:$0xff]   ;;  %v603_v27 = vld [vmem:[%s2867_s4] sm:$0xf] }
 0x13f   : > { %v2425_v26 = vld [vmem:[%s2868_s5 + $0xb8] sm:$0xff]  }
 0x141   : > { %1327 = vmatpush1.bf16.msra.mxu0 %v2352_v28  ;;  %1413 = vmatpush1.bf16.msra.mxu1 %v2355_v29  ;;  %v608_v28 = vrot.slane %v603_v27, %v310_v14  ;;  %v616_v29 = vrot.slane %v603_v27, %v318_v18 }
 0x142   : > { %1328 = vmatprep.subr.bf16.mxu0 %v2360_v30  ;;  %1414 = vmatprep.subr.bf16.mxu1 %v2363_v31  ;;  %v612_v30 = vrot.slane %v603_v27, %v314_v16  ;;  %v620_v31 = vrot.slane %v603_v27, %v322_v20 }
 0x145   : > { %1329 = vmatpush1.bf16.msra.mxu0 %v2358_v32  ;;  %1415 = vmatpush1.bf16.msra.mxu1 %v2361_v33 }
 0x146   : > { %1330 = vmatprep.subr.bf16.mxu0 %v2366_v34  ;;  %1416 = vmatprep.subr.bf16.mxu1 %v2369_v35 }
 0x149   : > { %1331 = vmatpush1.bf16.msra.mxu0 %v2364_v36  ;;  %1417 = vmatpush1.bf16.msra.mxu1 %v2367_v37 }
 0x14a   : > { %1332 = vmatprep.subr.bf16.mxu0 %v2372_v38  ;;  %1418 = vmatprep.subr.bf16.mxu1 %v2375_v39 }
 0x14d   : > { %1333 = vmatpush1.bf16.msra.mxu0 %v2370_v40  ;;  %1419 = vmatpush1.bf16.msra.mxu1 %v2373_v41 }
 0x14e   : > { %1334 = vmatprep.subr.bf16.mxu0 %v2378_v42  ;;  %1420 = vmatprep.subr.bf16.mxu1 %v2381_v43 }
 0x151   : > { %1335 = vmatpush1.bf16.msra.mxu0 %v2376_v44  ;;  %1421 = vmatpush1.bf16.msra.mxu1 %v2379_v45 }
 0x152   : > { %1336 = vmatprep.subr.bf16.mxu0 %v2384_v46  ;;  %1422 = vmatprep.subr.bf16.mxu1 %v2387_v47 }
 0x155   : > { %1337 = vmatpush1.bf16.msra.mxu0 %v2382_v48  ;;  %1423 = vmatpush1.bf16.msra.mxu1 %v2385_v49 }
 0x156   : > { %1338 = vmatprep.subr.bf16.mxu0 %v2390_v50  ;;  %1424 = vmatprep.subr.bf16.mxu1 %v2393_v51 }
 0x159   : > { %1339 = vmatpush1.bf16.msra.mxu0 %v2388_v52  ;;  %1425 = vmatpush1.bf16.msra.mxu1 %v2391_v54 }
 0x15a   : > { %2074 = vmatprep.subr.bf16.mxu0 %v2394_v55  ;;  %2096 = vmatprep.subr.bf16.mxu1 %v2395_v56 }
 0x15c   : > { %1341 = vmatmul.mubr.bf16.vlgmr.msra.gmra.mrb[4].mxu0 %v2699_v53  ;;  %1427 = vmatmul.mubr.bf16.vlgmr.msra.gmra.mrb[4].mxu1 %v2699_v53  ;;  %v2403_v53 = vld [vmem:[%s2868_s5 + $0xd0] sm:$0xff]  }
 0x15d   : > { %2075 = vmatpush3.bf16.msra.mxu0 %v2396_v57  ;;  %2097 = vmatpush3.bf16.msra.mxu1 %v2397_v58  ;;  %v2035_v58 = vld [vmem:[%s2869_s6] ss:$0 sm:$0xff] }
 0x15e   : > { %2076 = vmatprep.subr.bf16.mxu0 %v2398_v59  ;;  %2098 = vmatprep.subr.bf16.mxu1 %v2399_v60 }
 0x161   : > { %2077 = vmatpush3.bf16.msra.mxu0 %v2400_v61  ;;  %2099 = vmatpush3.bf16.msra.mxu1 %v2401_v62 }
 0x162   : > { %2078 = vmatprep.subr.bf16.mxu0 %v2402_v63  ;;  %2100 = vmatprep.subr.bf16.mxu1 %v2403_v53 }
 0x165   : > { %2079 = vmatpush3.bf16.msra.mxu0 %v2404_v0  ;;  %2101 = vmatpush3.bf16.msra.mxu1 %v2405_v1 }
 0x166   : > { %2080 = vmatprep.subr.bf16.mxu0 %v2406_v2  ;;  %2102 = vmatprep.subr.bf16.mxu1 %v2407_v3 }
 0x169   : > { %2081 = vmatpush3.bf16.msra.mxu0 %v2408_v4  ;;  %2103 = vmatpush3.bf16.msra.mxu1 %v2409_v5 }
 0x16a   : > { %2082 = vmatprep.subr.bf16.mxu0 %v2410_v6  ;;  %2104 = vmatprep.subr.bf16.mxu1 %v2411_v7 }
 0x16d   : > { %2083 = vmatpush3.bf16.msra.mxu0 %v2412_v8  ;;  %2105 = vmatpush3.bf16.msra.mxu1 %v2413_v9 }
 0x16e   : > { %2084 = vmatprep.subr.bf16.mxu0 %v2414_v10  ;;  %2106 = vmatprep.subr.bf16.mxu1 %v2415_v11 }
 0x171   : > { %2085 = vmatpush3.bf16.msra.mxu0 %v2416_v12  ;;  %2107 = vmatpush3.bf16.msra.mxu1 %v2417_v15 }
 0x172   : > { %2086 = vmatprep.subr.bf16.mxu0 %v2418_v17  ;;  %2108 = vmatprep.subr.bf16.mxu1 %v2419_v19 }
 0x175   : > { %2087 = vmatpush3.bf16.msra.mxu0 %v2420_v21  ;;  %2109 = vmatpush3.bf16.msra.mxu1 %v2421_v22 }
 0x176   : > { %2088 = vmatprep.subr.bf16.mxu0 %v2422_v23  ;;  %2110 = vmatprep.subr.bf16.mxu1 %v2423_v24 }
 0x179   : > { %2089 = vmatpush3.bf16.msra.mxu0 %v2424_v25  ;;  %2111 = vmatpush3.bf16.msra.mxu1 %v2425_v26 }
 0x22f   : > { %v1342_v32 = vpop.f32.mrb[4].mxu0  ;;  %v1428_v33 = vpop.f32.mrb[4].mxu1 }
 0x230   : > { %v2118_v34 = vadd.f32 %v1342_v32, %v608_v28  ;;  %v2122_v35 = vadd.f32 %v1428_v33, %v616_v29  ;;  %v1344_v36 = vpop.f32.mrb[5].mxu0  ;;  %v1430_v37 = vpop.f32.mrb[5].mxu1 }
 0x231   : > { %v2119_v38 = vadd.f32 %v1344_v36, %v612_v30  ;;  %v2123_v39 = vadd.f32 %v1430_v37, %v620_v31  ;;  %v1346_v40 = vpop.f32.mrb[6].mxu0  ;;  %v1432_v41 = vpop.f32.mrb[6].mxu1 }
 0x232   : > { %v2120_v14 = vadd.f32 %v1346_v40, %v608_v28  ;;  %v2124_v42 = vadd.f32 %v1432_v41, %v616_v29  ;;  %v1348_v43 = vpop.f32.mrb[7].mxu0  ;;  %v1434_v18 = vpop.f32.mrb[7].mxu1  ;;  %v1437_v16 = vmax.f32 %v2118_v34, 0.0  ;;  %v1439_v13 = vmax.f32 %v2122_v35, 0.0 }
 0x233   : > { %v2121_v44 = vadd.f32 %v1348_v43, %v612_v30  ;;  %v2125_v45 = vadd.f32 %v1434_v18, %v620_v31  ;;  %v1438_v47 = vmax.f32 %v2119_v38, 0.0  ;;  %v1440_v48 = vmax.f32 %v2123_v39, 0.0 }
 0x234   : > { %v1441_v20 = vmax.f32 %v2120_v14, 0.0  ;;  %v1443_v46 = vmax.f32 %v2124_v42, 0.0 }
 0x235   : > { %v1442_v49 = vmax.f32 %v2121_v44, 0.0  ;;  %v1444_v50 = vmax.f32 %v2125_v45, 0.0 }
 0x236   : > { %v1445_v51 = vpack.c.bf16 %v1441_v20, %v1437_v16  ;;  %v1447_v52 = vpack.c.bf16 %v1443_v46, %v1439_v13 }
 0x237   : > { %v1446_v54 = vpack.c.bf16 %v1442_v49, %v1438_v47  ;;  %v1448_v55 = vpack.c.bf16 %v1444_v50, %v1440_v48 }
 0x239   : > { %1744 = vmatprep.mubr.bf16.mxu0 %v1446_v54  ;;  %1785 = vmatprep.mubr.bf16.mxu1 %v1448_v55 }
 0x23a   : > { %1745 = vmatmul.mubr.bf16.vlgmr.msra.gmra.mrb[8].mxu0 %v1445_v51  ;;  %1786 = vmatmul.mubr.bf16.vlgmr.msra.gmra.mrb[8].mxu1 %v1447_v52 }
 0x30d   : > { %v2090_v56 = vpop.f32.mrb[8].mxu0  ;;  %v2112_v57 = vpop.f32.mrb[8].mxu1 }
 0x30e   : > { %v2091_v59 = vpop.f32.mrb[9].mxu0  ;;  %v2113_v60 = vpop.f32.mrb[9].mxu1 }
 0x30f   : > { %v2092_v61 = vadd.f32 %v2091_v59, %v2090_v56  ;;  %v2114_v62 = vadd.f32 %v2113_v60, %v2112_v57  ;;  %v2093_v63 = vpop.f32.mrb[10].mxu0  ;;  %v2115_v53 = vpop.f32.mrb[10].mxu1 }
 0x310   : > { %v2094_v0 = vpop.f32.mrb[11].mxu0  ;;  %v2116_v1 = vpop.f32.mrb[11].mxu1 }
 0x311   : > { %v1747_v2 = vadd.f32 %v2092_v61, %v2035_v58  ;;  %v2095_v3 = vadd.f32 %v2094_v0, %v2093_v63  ;;  %v2117_v4 = vadd.f32 %v2116_v1, %v2115_v53 }
 0x313   : > { %v1788_v5 = vadd.f32 %v2114_v62, %v1747_v2  ;;  %v1750_v6 = vadd.f32 %v2095_v3, %v2035_v58 }
 0x315   : > { %v1794_v7 = vmax.f32 %v1788_v5, 0.0  ;;  %v1791_v8 = vadd.f32 %v2117_v4, %v1750_v6 }
 0x317   : > { %1797 = vst.msk [vmem:[%s287_s8] sm:$0xff] %vm1796_vm1, %v1794_v7  ;;  %v1795_v9 = vmax.f32 %v1791_v8, 0.0 }
 0x319   : > { %1798 = vst.msk [vmem:[%s287_s8 + $0x8] sm:$0xff] %vm1796_vm1, %v1795_v9 }
 0x31a   : > { %2467 = shalt.err (!%p2464_p7)
}
 0x31b   : > { %s2468_s15 = scalar_lea.hbm %s2818_s18, 256  ;;  %s2472_s23 = scalar_lea.hbm %s2870_s7, 512 }
 0x31c   : > { %p2469_p8 = scmp.ne.s32.totalorder %s2818_s18, %s2468_s15  ;;  %p2473_p1 = scmp.lt.u32.totalorder %s2818_s18, %s2870_s7 }
 0x31d   : > { %p2474_p0 = scmp.lt.u32.totalorder %s2472_s23, %s2468_s15  ;;  %p2476_p6 = scmp.lt.u32.totalorder %s2468_s15, %s2818_s18 }
 0x31e   : > { %p2470_p11 = pnand %p2469_p8, %p2881_p9 }
 0x31f   : > { %p2475_p5 = por %p2474_p0, %p2473_p1 }
 0x320   : > { %p2471_p13 = pneg %p2470_p11 }
 0x321   : > { %p2477_p10 = por %p2476_p6, %p2475_p5 }
 0x323   : > { %p2478_p12 = pnand %p2477_p10, %p2471_p13 }
 0x325   : > { %2481 = shalt.err (!%p2478_p12)
}
 0x326   : > { %s2527_s14 = smov 128   ;;  %s2528_s17 = smov 8  }
 0x327   : > { %2138 = dma.vmem_to_hbm [thread:$0]  (%p2881_p9), %s2820_s9, 256, %s2818_s18, %s2822_s19, %s2527_s14, %s2527_s14, %s2528_s17  }
 0x328 PF: > { %p2150_p2 = scmp.ge.s32.totalorder %s2520_s27, 2  ;;  %s1828_s28 = sand.u32 1, %s2508_s24  }
 0x329   : > { %p2882_p3 = scmp.ne.s32.totalorder %s2875_s12, 0  ;;  %s1829_s20 = scalar_lea.sflag [#allocation4], %s1828_s28 }
 0x32b   : > { %p2145_p4 = pnand %p2150_p2, %p2882_p3 }
 0x32d   : > { %2503 = dma.done.wait (!%p2145_p4), %s1829_s20, 256  }
 0x32e   : > { %2505 = vsyncadd (!%p2145_p4), %s1829_s20, 4294967040  ;;  %p18_p7 = scmp.ge.s32.totalorder %s2594_s30, 4   ;;  %s2883_s24 = smov %s2512_s25 }
 0x32f   : > { %s2884_s25 = smov %s2516_s26  ;;  %s2885_s26 = smov %s2605_s10 }
 0x330   : > { %s2886_s27 = smov %s2594_s30  ;;  %20 = sbr.rel (!%p18_p7) target bundleno = 4 (0x4), region = 88 }
 0x337   :  { %1834 = vsyncpa [#allocation3], 1 }
 0x338   :  { %1836 = vsyncpa [#allocation3 + $0x1], 1 }
 0x339   :  { %1837 = vsyncpa [#allocation4], 1 }
 0x33a   :  { %1839 = vsyncpa [#allocation4 + $0x1], 1 }

</bundles_post_ra>
